<compile_context>
chip_gen: v6e
topology: v6e:2x2x1
jax: 0.10.0
libtpu: 0.0.40
codegen_flags: <defaults>
</compile_context>

<pallas_src>
import jax
import jax.numpy as jnp
from jax.experimental import pallas as pl
from jax.experimental.pallas import tpu as pltpu


def prototype_network_kernel(x_ref, w_enc_ref, b_enc_ref, proto_t_ref,
                             proto_sq_ref, w_out_ref, b_out_ref,
                             out_ref, sim_ref, enc_ref):
    # ---- encoder: encodings = relu(x @ W_enc + b_enc) ----
    x = x_ref[...]
    enc = jnp.dot(x, w_enc_ref[...], preferred_element_type=jnp.float32)
    enc = jnp.maximum(enc + b_enc_ref[...], 0.0)
    enc_ref[...] = enc.astype(enc_ref.dtype)

    # ---- prototype layer via matmul identity ----
    # sq_dist[b, p] = ||enc[b]||^2 + ||proto[p]||^2 - 2 * enc[b] . proto[p]
    enc_sq = jnp.sum(enc * enc, axis=-1, keepdims=True)            # (TB, 1)
    cross = jnp.dot(enc, proto_t_ref[...],                         # (TB, P)
                    preferred_element_type=jnp.float32)
    sq_dist = enc_sq + proto_sq_ref[...] - 2.0 * cross
    sq_dist = jnp.maximum(sq_dist, 0.0)   # guard against cancellation negatives
    sim = jnp.exp(-sq_dist)
    sim_ref[...] = sim.astype(sim_ref.dtype)

    # ---- output layer: outputs = sim @ W_out + b_out ----
    out = jnp.dot(sim, w_out_ref[...], preferred_element_type=jnp.float32)
    out_ref[...] = (out + b_out_ref[...]).astype(out_ref.dtype)


def _round_up(n, m):
    return ((n + m - 1) // m) * m


def prototype_network(x, w_enc, b_enc, prototypes, w_out, b_out, *, tb=None):
    B, D_in = x.shape
    H = w_enc.shape[1]
    P = prototypes.shape[0]
    O = w_out.shape[1]

    f32 = jnp.float32

    # Lane-dense padding (multiples of 128) — zero padding is exact:
    # padded D_in/H columns contribute 0 to matmuls and distances, padded
    # prototypes / output columns are sliced away below.
    D_pad = _round_up(D_in, 128)
    H_pad = _round_up(H, 128)
    P_pad = _round_up(P, 128)
    O_pad = _round_up(O, 128)

    # Batch tile: biggest reasonable tile, sublane-aligned.
    if tb is None:
        tb = min(256, _round_up(B, 8))
    B_pad = _round_up(B, tb)

    xp = jnp.zeros((B_pad, D_pad), f32).at[:B, :D_in].set(x.astype(f32))
    w_enc_p = jnp.zeros((D_pad, H_pad), f32).at[:D_in, :H].set(w_enc.astype(f32))
    b_enc_p = jnp.zeros((1, H_pad), f32).at[0, :H].set(b_enc.astype(f32))
    proto_t = jnp.zeros((H_pad, P_pad), f32).at[:H, :P].set(
        prototypes.T.astype(f32))
    proto_sq = jnp.zeros((1, P_pad), f32).at[0, :P].set(
        jnp.sum(prototypes.astype(f32) * prototypes.astype(f32), axis=-1))
    w_out_p = jnp.zeros((P_pad, O_pad), f32).at[:P, :O].set(w_out.astype(f32))
    b_out_p = jnp.zeros((1, O_pad), f32).at[0, :O].set(b_out.astype(f32))

    grid = (B_pad // tb,)

    def resident(shape):
        return pl.BlockSpec(shape, lambda i: (0, 0))

    def tiled(cols):
        return pl.BlockSpec((tb, cols), lambda i: (i, 0))

    out_shapes = (
        jax.ShapeDtypeStruct((B_pad, O_pad), f32),   # outputs
        jax.ShapeDtypeStruct((B_pad, P_pad), f32),   # similarities
        jax.ShapeDtypeStruct((B_pad, H_pad), f32),   # encodings
    )

    outputs, similarities, encodings = pl.pallas_call(
        prototype_network_kernel,
        out_shape=out_shapes,
        grid_spec=pltpu.PrefetchScalarGridSpec(
            num_scalar_prefetch=0,
            grid=grid,
            in_specs=[
                tiled(D_pad),                     # x            (batch-tiled)
                resident((D_pad, H_pad)),         # W_enc        (VMEM-resident)
                resident((1, H_pad)),             # b_enc
                resident((H_pad, P_pad)),         # prototypes^T
                resident((1, P_pad)),             # ||proto||^2
                resident((P_pad, O_pad)),         # W_out
                resident((1, O_pad)),             # b_out
            ],
            out_specs=[
                tiled(O_pad),                     # outputs
                tiled(P_pad),                     # similarities
                tiled(H_pad),                     # encodings
            ],
        ),
        compiler_params=pltpu.CompilerParams(
            dimension_semantics=("parallel",),
            vmem_limit_bytes=48 * 1024 * 1024,
        ),
    )(xp, w_enc_p, b_enc_p, proto_t, proto_sq, w_out_p, b_out_p)

    return (outputs[:B, :O], similarities[:B, :P], encodings[:B, :H])


def reference(x, w_enc, b_enc, prototypes, w_out, b_out):
    enc = jnp.maximum(x @ w_enc + b_enc, 0.0)
    diff = enc[:, None, :] - prototypes[None, :, :]
    sim = jnp.exp(-jnp.sum(diff * diff, axis=-1))
    out = sim @ w_out + b_out
    return out, sim, enc


if __name__ == "__main__":
    # Small deterministic shapes consistent with the module.
    B, D_in, H, P, O = 8, 16, 32, 16, 4

    key = jax.random.PRNGKey(0)
    k_x, k_we, k_be, k_p, k_wo, k_bo = jax.random.split(key, 6)

    x = jax.random.normal(k_x, (B, D_in), dtype=jnp.float32)

    # Encoder Linear(D_in -> H): uniform(-1/sqrt(D_in), 1/sqrt(D_in))
    ke = 1.0 / jnp.sqrt(D_in)
    w_enc = jax.random.uniform(k_we, (D_in, H), minval=-ke, maxval=ke,
                               dtype=jnp.float32)
    b_enc = jax.random.uniform(k_be, (H,), minval=-ke, maxval=ke,
                               dtype=jnp.float32)

    # Prototype layer: prototypes = k + (-2k) * U(0,1)  => uniform(-k, k)
    kp = 1.0 / jnp.sqrt(H)
    prototypes = kp + (-2.0 * kp) * jax.random.uniform(
        k_p, (P, H), dtype=jnp.float32)

    # Output Linear(P -> O): uniform(-1/sqrt(P), 1/sqrt(P))
    ko = 1.0 / jnp.sqrt(P)
    w_out = jax.random.uniform(k_wo, (P, O), minval=-ko, maxval=ko,
                               dtype=jnp.float32)
    b_out = jax.random.uniform(k_bo, (O,), minval=-ko, maxval=ko,
                               dtype=jnp.float32)

    outputs, similarities, encodings = prototype_network(
        x, w_enc, b_enc, prototypes, w_out, b_out)
    jax.block_until_ready((outputs, similarities, encodings))

    ref_out, ref_sim, ref_enc = reference(
        x, w_enc, b_enc, prototypes, w_out, b_out)
    assert jnp.allclose(outputs, ref_out, atol=1e-5, rtol=1e-5)
    assert jnp.allclose(similarities, ref_sim, atol=1e-5, rtol=1e-5)
    assert jnp.allclose(encodings, ref_enc, atol=1e-5, rtol=1e-5)

    print("KERNEL_OK")
</pallas_src>

<mosaic_0001>
module attributes {stable_mosaic.version = 11 : i64} {
  func.func @prototype_network_kernel(%arg0: i32, %arg1: memref<8x128xf32, #tpu.memory_space<vmem>>, %arg2: memref<128x128xf32, #tpu.memory_space<vmem>>, %arg3: memref<1x128xf32, #tpu.memory_space<vmem>>, %arg4: memref<128x128xf32, #tpu.memory_space<vmem>>, %arg5: memref<1x128xf32, #tpu.memory_space<vmem>>, %arg6: memref<128x128xf32, #tpu.memory_space<vmem>>, %arg7: memref<1x128xf32, #tpu.memory_space<vmem>>, %arg8: memref<8x128xf32, #tpu.memory_space<vmem>>, %arg9: memref<8x128xf32, #tpu.memory_space<vmem>>, %arg10: memref<8x128xf32, #tpu.memory_space<vmem>>) attributes {dimension_semantics = [#tpu.dimension_semantics<parallel>], iteration_bounds = array<i64: 1>, scalar_prefetch = 0 : i64, scratch_operands = 0 : i64, tpu.core_type = #tpu.core_type<tc>, window_params = [{transform_indices = @transform_0, window_bounds = array<i64: 8, 128>}, {pipeline_mode = #tpu.pipeline_mode<synchronous>, transform_indices = @transform_1, window_bounds = array<i64: 128, 128>}, {pipeline_mode = #tpu.pipeline_mode<synchronous>, transform_indices = @transform_2, window_bounds = array<i64: 1, 128>}, {pipeline_mode = #tpu.pipeline_mode<synchronous>, transform_indices = @transform_3, window_bounds = array<i64: 128, 128>}, {pipeline_mode = #tpu.pipeline_mode<synchronous>, transform_indices = @transform_4, window_bounds = array<i64: 1, 128>}, {pipeline_mode = #tpu.pipeline_mode<synchronous>, transform_indices = @transform_5, window_bounds = array<i64: 128, 128>}, {pipeline_mode = #tpu.pipeline_mode<synchronous>, transform_indices = @transform_6, window_bounds = array<i64: 1, 128>}, {transform_indices = @transform_7, window_bounds = array<i64: 8, 128>}, {transform_indices = @transform_8, window_bounds = array<i64: 8, 128>}, {transform_indices = @transform_9, window_bounds = array<i64: 8, 128>}]} {
    %c0 = arith.constant 0 : index
    %c0_0 = arith.constant 0 : index
    %0 = vector.load %arg1[%c0, %c0_0] : memref<8x128xf32, #tpu.memory_space<vmem>>, vector<8x128xf32>
    %c0_1 = arith.constant 0 : index
    %c0_2 = arith.constant 0 : index
    %1 = vector.load %arg2[%c0_1, %c0_2] : memref<128x128xf32, #tpu.memory_space<vmem>>, vector<128x128xf32>
    %cst = arith.constant dense<0.000000e+00> : vector<8x128xf32>
    %2 = tpu.matmul %0, %1, %cst {dimension_numbers = #tpu.dot_dimension_numbers<[1], [0], [0], [1], [0, 0, 1, 1], [], []>} : vector<8x128xf32>, vector<128x128xf32>, vector<8x128xf32> -> vector<8x128xf32>
    %c0_3 = arith.constant 0 : index
    %c0_4 = arith.constant 0 : index
    %3 = vector.load %arg3[%c0_3, %c0_4] : memref<1x128xf32, #tpu.memory_space<vmem>>, vector<1x128xf32>
    %4 = vector.broadcast %3 : vector<1x128xf32> to vector<8x128xf32>
    %5 = arith.addf %2, %4 : vector<8x128xf32>
    %cst_5 = arith.constant 0.000000e+00 : f32
    %6 = vector.broadcast %cst_5 : f32 to vector<8x128xf32>
    %7 = arith.maximumf %5, %6 : vector<8x128xf32>
    %c0_6 = arith.constant 0 : index
    %c0_7 = arith.constant 0 : index
    %8 = vector.load %arg10[%c0_6, %c0_7] : memref<8x128xf32, #tpu.memory_space<vmem>>, vector<8x128xf32>
    tpu.vector_store %arg10[%c0_6, %c0_7], %7 {strides = array<i32>} : memref<8x128xf32, #tpu.memory_space<vmem>>, vector<8x128xf32>,
    %9 = arith.mulf %7, %7 : vector<8x128xf32>
    %cst_8 = arith.constant dense<0.000000e+00> : vector<8xf32>
    %10 = vector.multi_reduction <add>, %9, %cst_8 [1] : vector<8x128xf32> to vector<8xf32>
    %11 = vector.shape_cast %10 : vector<8xf32> to vector<8x1xf32>
    %c0_9 = arith.constant 0 : index
    %c0_10 = arith.constant 0 : index
    %12 = vector.load %arg4[%c0_9, %c0_10] : memref<128x128xf32, #tpu.memory_space<vmem>>, vector<128x128xf32>
    %cst_11 = arith.constant dense<0.000000e+00> : vector<8x128xf32>
    %13 = tpu.matmul %7, %12, %cst_11 {dimension_numbers = #tpu.dot_dimension_numbers<[1], [0], [0], [1], [0, 0, 1, 1], [], []>} : vector<8x128xf32>, vector<128x128xf32>, vector<8x128xf32> -> vector<8x128xf32>
    %c0_12 = arith.constant 0 : index
    %c0_13 = arith.constant 0 : index
    %14 = vector.load %arg5[%c0_12, %c0_13] : memref<1x128xf32, #tpu.memory_space<vmem>>, vector<1x128xf32>
    %15 = vector.broadcast %11 : vector<8x1xf32> to vector<8x128xf32>
    %16 = vector.broadcast %14 : vector<1x128xf32> to vector<8x128xf32>
    %17 = arith.addf %15, %16 : vector<8x128xf32>
    %cst_14 = arith.constant 2.000000e+00 : f32
    %18 = vector.broadcast %cst_14 : f32 to vector<8x128xf32>
    %19 = arith.mulf %18, %13 : vector<8x128xf32>
    %20 = arith.subf %17, %19 : vector<8x128xf32>
    %cst_15 = arith.constant 0.000000e+00 : f32
    %21 = vector.broadcast %cst_15 : f32 to vector<8x128xf32>
    %22 = arith.maximumf %20, %21 : vector<8x128xf32>
    %cst_16 = arith.constant 0.000000e+00 : f32
    %23 = vector.broadcast %cst_16 : f32 to vector<8x128xf32>
    %24 = arith.subf %23, %22 : vector<8x128xf32>
    %25 = math.exp %24 : vector<8x128xf32>
    %c0_17 = arith.constant 0 : index
    %c0_18 = arith.constant 0 : index
    %26 = vector.load %arg9[%c0_17, %c0_18] : memref<8x128xf32, #tpu.memory_space<vmem>>, vector<8x128xf32>
    tpu.vector_store %arg9[%c0_17, %c0_18], %25 {strides = array<i32>} : memref<8x128xf32, #tpu.memory_space<vmem>>, vector<8x128xf32>,
    %c0_19 = arith.constant 0 : index
    %c0_20 = arith.constant 0 : index
    %27 = vector.load %arg6[%c0_19, %c0_20] : memref<128x128xf32, #tpu.memory_space<vmem>>, vector<128x128xf32>
    %cst_21 = arith.constant dense<0.000000e+00> : vector<8x128xf32>
    %28 = tpu.matmul %25, %27, %cst_21 {dimension_numbers = #tpu.dot_dimension_numbers<[1], [0], [0], [1], [0, 0, 1, 1], [], []>} : vector<8x128xf32>, vector<128x128xf32>, vector<8x128xf32> -> vector<8x128xf32>
    %c0_22 = arith.constant 0 : index
    %c0_23 = arith.constant 0 : index
    %29 = vector.load %arg7[%c0_22, %c0_23] : memref<1x128xf32, #tpu.memory_space<vmem>>, vector<1x128xf32>
    %30 = vector.broadcast %29 : vector<1x128xf32> to vector<8x128xf32>
    %31 = arith.addf %28, %30 : vector<8x128xf32>
    %c0_24 = arith.constant 0 : index
    %c0_25 = arith.constant 0 : index
    %32 = vector.load %arg8[%c0_24, %c0_25] : memref<8x128xf32, #tpu.memory_space<vmem>>, vector<8x128xf32>
    tpu.vector_store %arg8[%c0_24, %c0_25], %31 {strides = array<i32>} : memref<8x128xf32, #tpu.memory_space<vmem>>, vector<8x128xf32>,
    return
  }
  func.func @transform_0(%arg0: i32) -> (i32, i32) {
    %c0_i32 = arith.constant 0 : i32
    %c0_i32_0 = arith.constant 0 : i32
    return %arg0, %c0_i32 : i32, i32
  }
  func.func @transform_1(%arg0: i32) -> (i32, i32) {
    %c0_i32 = arith.constant 0 : i32
    %c0_i32_0 = arith.constant 0 : i32
    %c0_i32_1 = arith.constant 0 : i32
    return %c0_i32, %c0_i32_0 : i32, i32
  }
  func.func @transform_2(%arg0: i32) -> (i32, i32) {
    %c0_i32 = arith.constant 0 : i32
    %c0_i32_0 = arith.constant 0 : i32
    %c0_i32_1 = arith.constant 0 : i32
    return %c0_i32, %c0_i32_0 : i32, i32
  }
  func.func @transform_3(%arg0: i32) -> (i32, i32) {
    %c0_i32 = arith.constant 0 : i32
    %c0_i32_0 = arith.constant 0 : i32
    %c0_i32_1 = arith.constant 0 : i32
    return %c0_i32, %c0_i32_0 : i32, i32
  }
  func.func @transform_4(%arg0: i32) -> (i32, i32) {
    %c0_i32 = arith.constant 0 : i32
    %c0_i32_0 = arith.constant 0 : i32
    %c0_i32_1 = arith.constant 0 : i32
    return %c0_i32, %c0_i32_0 : i32, i32
  }
  func.func @transform_5(%arg0: i32) -> (i32, i32) {
    %c0_i32 = arith.constant 0 : i32
    %c0_i32_0 = arith.constant 0 : i32
    %c0_i32_1 = arith.constant 0 : i32
    return %c0_i32, %c0_i32_0 : i32, i32
  }
  func.func @transform_6(%arg0: i32) -> (i32, i32) {
    %c0_i32 = arith.constant 0 : i32
    %c0_i32_0 = arith.constant 0 : i32
    %c0_i32_1 = arith.constant 0 : i32
    return %c0_i32, %c0_i32_0 : i32, i32
  }
  func.func @transform_7(%arg0: i32) -> (i32, i32) {
    %c0_i32 = arith.constant 0 : i32
    %c0_i32_0 = arith.constant 0 : i32
    return %arg0, %c0_i32 : i32, i32
  }
  func.func @transform_8(%arg0: i32) -> (i32, i32) {
    %c0_i32 = arith.constant 0 : i32
    %c0_i32_0 = arith.constant 0 : i32
    return %arg0, %c0_i32 : i32, i32
  }
  func.func @transform_9(%arg0: i32) -> (i32, i32) {
    %c0_i32 = arith.constant 0 : i32
    %c0_i32_0 = arith.constant 0 : i32
    return %arg0, %c0_i32 : i32, i32
  }
}

</mosaic_0001>

<bundles_post_ra>
// kernel: tpu_custom_call.1
= control target key start
LH: loop header
LB: loop body
LE: loop exit
PB: predicated region body
PF: predicated region fallthrough
CT: control target
= control target key end

     0   :  { %15 = vsyncpa [#allocation3], 0  ;;  %s898_s0 = inlined_call_operand.hbm [shape: f32[8,128], index: 0, kind: input, shape index: {}]   ;;  %s899_s1 = inlined_call_operand.hbm [shape: f32[128,128], index: 1, kind: input, shape index: {}]   ;;  %s900_s2 = inlined_call_operand.vmem [shape: f32[1,128], index: 2, kind: input, shape index: {}]   ;;  %s901_s3 = inlined_call_operand.hbm [shape: f32[128,128], index: 3, kind: input, shape index: {}]   ;;  %s902_s4 = inlined_call_operand.vmem [shape: f32[1,128], index: 4, kind: input, shape index: {}]   ;;  %s903_s5 = inlined_call_operand.hbm [shape: f32[128,128], index: 5, kind: input, shape index: {}]   ;;  %s904_s6 = inlined_call_operand.vmem [shape: f32[1,128], index: 6, kind: input, shape index: {}]   ;;  %s905_s7 = inlined_call_operand.hbm [shape: f32[8,128], index: 7, kind: output, shape index: {0}]   ;;  %s906_s8 = inlined_call_operand.hbm [shape: f32[8,128], index: 8, kind: output, shape index: {1}]   ;;  %s907_s9 = inlined_call_operand.hbm [shape: f32[8,128], index: 9, kind: output, shape index: {2}]  }
   0x1   :  { %16 = vsyncpa [#allocation6], 0 }
   0x2   :  { %17 = vsyncpa [#allocation9], 0 }
   0x3   :  { %18 = vsyncpa [#allocation4], 0 }
   0x4   :  { %19 = vsyncpa [#allocation12], 0  ;;  %s744_s30 = smov [#allocation5]  }
   0x5   :  { %s35_s10 = sshll.u32 %s744_s30, 4  ;;  %s36_s10 = int_to_ptr.vmem [resolvable:$true] %s35_s10 }
   0x6   :  { %s602_s11 = scalar_lea.vmem %s36_s10, 2048  ;;  %p607_p1 = scmp.lt.s32.totalorder %s36_s10, %s36_s10 }
   0x7   :  { %p603_p0 = scmp.ne.s32.totalorder %s36_s10, %s602_s11  ;;  %p608_p2 = scmp.lt.s32.totalorder %s602_s11, %s602_s11 }
   0x9   :  { %p609_p3 = por %p608_p2, %p607_p1 }
   0xb   :  { %p610_p4 = pnand %p609_p3, %p603_p0 }
   0xd   :  { %613 = shalt.err (!%p610_p4)
}
   0xe   :  { %s745_s12 = smov 128   ;;  %s746_s13 = smov 8  }
   0xf   :  { %41 = dma.hbm_to_vmem [thread:$0]  %s899_s1, 2048, %s36_s10, [#allocation6], %s745_s12, %s745_s12, %s746_s13  }
  0x10   :  { %s747_s16 = smov [#allocation2]   ;;  %s748_s18 = smov [#allocation7]  }
  0x11   :  { %s26_s17 = sshll.u32 %s747_s16, 4  ;;  %s49_s19 = sshll.u32 %s748_s18, 4  ;;  %s27_s17 = int_to_ptr.vmem [resolvable:$true] %s26_s17  ;;  %s50_s19 = int_to_ptr.vmem [resolvable:$true] %s49_s19 }
  0x12   :  { %s622_s20 = scalar_lea.vmem %s27_s17, 128  ;;  %p627_p6 = scmp.lt.s32.totalorder %s27_s17, %s27_s17 }
  0x13   :  { %p623_p5 = scmp.ne.s32.totalorder %s27_s17, %s622_s20  ;;  %p628_p7 = scmp.lt.s32.totalorder %s622_s20, %s622_s20 }
  0x15   :  { %p629_p8 = por %p628_p7, %p627_p6 }
  0x17   :  { %p630_p9 = pnand %p629_p8, %p623_p5 }
  0x19   :  { %633 = shalt.err (!%p630_p9)
}
  0x1a   :  { %29 = dma.hbm_to_vmem [thread:$0]  %s898_s0, 128, %s27_s17, [#allocation3]  }
  0x1b   :  { %s642_s23 = scalar_lea.vmem %s50_s19, 2048  ;;  %p647_p11 = scmp.lt.s32.totalorder %s50_s19, %s50_s19 }
  0x1c   :  { %p643_p10 = scmp.ne.s32.totalorder %s50_s19, %s642_s23  ;;  %p648_p12 = scmp.lt.s32.totalorder %s642_s23, %s642_s23 }
  0x1e   :  { %p649_p13 = por %p648_p12, %p647_p11 }
  0x20   :  { %p650_p0 = pnand %p649_p13, %p643_p10 }
  0x22   :  { %653 = shalt.err (!%p650_p0)
}
  0x23   :  { %55 = dma.hbm_to_vmem [thread:$0]  %s901_s3, 2048, %s50_s19, [#allocation6], %s745_s12, %s745_s12, %s746_s13  }
  0x24   :  { %s749_s25 = smov [#allocation8]  }
  0x25   :  { %s63_s26 = sshll.u32 %s749_s25, 4  ;;  %s64_s26 = int_to_ptr.vmem [resolvable:$true] %s63_s26 }
  0x26   :  { %s662_s27 = scalar_lea.vmem %s64_s26, 2048  ;;  %p667_p2 = scmp.lt.s32.totalorder %s64_s26, %s64_s26 }
  0x27   :  { %p663_p1 = scmp.ne.s32.totalorder %s64_s26, %s662_s27  ;;  %p668_p3 = scmp.lt.s32.totalorder %s662_s27, %s662_s27 }
  0x29   :  { %p669_p4 = por %p668_p3, %p667_p2 }
  0x2b   :  { %p670_p5 = pnand %p669_p4, %p663_p1 }
  0x2d   :  { %673 = shalt.err (!%p670_p5)
}
  0x2e   :  { %69 = dma.hbm_to_vmem [thread:$0]  %s903_s5, 2048, %s64_s26, [#allocation9], %s745_s12, %s745_s12, %s746_s13  }
  0x2f   :  { %734 = dma.done.wait [#allocation3], 128  }
  0x30   :  { %735 = vsyncadd [#allocation3], 4294967168 }
  0x31   :  { %736 = dma.done.wait [#allocation6], 4096  }
  0x32   :  { %737 = vsyncadd [#allocation6], 4294963200 }
  0x33   :  { %738 = dma.done.wait [#allocation9], 2048  }
  0x34   :  { %739 = vsyncadd [#allocation9], 4294965248  ;;  %v750_v0 = vmov 0.0   ;;  %vm751_vm0 = vmmov 0   ;;  %v100_v1 = vld [vmem:[#allocation5 + $0x78] sm:$0xff]  ;;  %v99_v2 = vld [vmem:[#allocation5 + $0x70] sm:$0xff] }
  0x35   :  { %476 = vmatprep.subr.mxu0 %v750_v0  ;;  %508 = vmatprep.mubr.msk.f32.mxu0 %vm751_vm0, %v750_v0  ;;  %v98_v3 = vld [vmem:[#allocation5 + $0x68] sm:$0xff]  ;;  %v97_v4 = vld [vmem:[#allocation5 + $0x60] sm:$0xff]  ;;  %v198_v5 = vld [vmem:[#allocation7 + $0x78] sm:$0xff]  ;;  %s752_s30 = smov [#allocation11]  }
  0x36   :  { %511 = vmatprep.subr.mxu1 %v750_v0  ;;  %543 = vmatprep.mubr.msk.f32.mxu1 %vm751_vm0, %v750_v0  ;;  %v96_v6 = vld [vmem:[#allocation5 + $0x58] sm:$0xff]  ;;  %v197_v7 = vld [vmem:[#allocation7 + $0x70] sm:$0xff]  ;;  %v196_v8 = vld [vmem:[#allocation7 + $0x68] sm:$0xff]  ;;  %s394_s10 = sshll.u32 %s752_s30, 4  ;;  %s395_s10 = int_to_ptr.vmem [resolvable:$true] %s394_s10 }
  0x37   :  { %477 = vmatpush3.msra.mxu0 %v100_v1  ;;  %512 = vmatpush3.msra.mxu1 %v198_v5  ;;  %v95_v9 = vld [vmem:[#allocation5 + $0x50] sm:$0xff]  ;;  %v195_v10 = vld [vmem:[#allocation7 + $0x60] sm:$0xff]  ;;  %v94_v11 = vld [vmem:[#allocation5 + $0x48] sm:$0xff]  ;;  %s674_s11 = scalar_lea.vmem %s395_s10, 128  ;;  %p679_p7 = scmp.lt.s32.totalorder %s395_s10, %s395_s10 }
  0x38   :  { %478 = vmatprep.subr.mxu0 %v750_v0  ;;  %513 = vmatprep.subr.mxu1 %v750_v0  ;;  %v194_v12 = vld [vmem:[#allocation7 + $0x58] sm:$0xff]  ;;  %v93_v13 = vld [vmem:[#allocation5 + $0x40] sm:$0xff]  ;;  %v193_v14 = vld [vmem:[#allocation7 + $0x50] sm:$0xff]  ;;  %p675_p6 = scmp.ne.s32.totalorder %s395_s10, %s674_s11  ;;  %p680_p8 = scmp.lt.s32.totalorder %s674_s11, %s674_s11 }
  0x39   :  { %479 = vmatpush3.msra.mxu0 %v99_v2  ;;  %514 = vmatpush3.msra.mxu1 %v197_v7  ;;  %v92_v15 = vld [vmem:[#allocation5 + $0x38] sm:$0xff]  ;;  %v192_v16 = vld [vmem:[#allocation7 + $0x48] sm:$0xff]  ;;  %v91_v17 = vld [vmem:[#allocation5 + $0x30] sm:$0xff] }
  0x3a   :  { %480 = vmatprep.subr.mxu0 %v750_v0  ;;  %515 = vmatprep.subr.mxu1 %v750_v0  ;;  %v191_v18 = vld [vmem:[#allocation7 + $0x40] sm:$0xff]  ;;  %v90_v19 = vld [vmem:[#allocation5 + $0x28] sm:$0xff]  ;;  %v190_v20 = vld [vmem:[#allocation7 + $0x38] sm:$0xff]  ;;  %p681_p9 = por %p680_p8, %p679_p7 }
  0x3b   :  { %481 = vmatpush3.msra.mxu0 %v98_v3  ;;  %516 = vmatpush3.msra.mxu1 %v196_v8  ;;  %v89_v21 = vld [vmem:[#allocation5 + $0x20] sm:$0xff]  ;;  %v189_v22 = vld [vmem:[#allocation7 + $0x30] sm:$0xff]  ;;  %v88_v23 = vld [vmem:[#allocation5 + $0x18] sm:$0xff] }
  0x3c   :  { %482 = vmatprep.subr.mxu0 %v750_v0  ;;  %517 = vmatprep.subr.mxu1 %v750_v0  ;;  %v188_v24 = vld [vmem:[#allocation7 + $0x28] sm:$0xff]  ;;  %v87_v25 = vld [vmem:[#allocation5 + $0x10] sm:$0xff]  ;;  %v187_v26 = vld [vmem:[#allocation7 + $0x20] sm:$0xff]  ;;  %p682_p10 = pnand %p681_p9, %p675_p6 }
  0x3d   :  { %483 = vmatpush3.msra.mxu0 %v97_v4  ;;  %518 = vmatpush3.msra.mxu1 %v195_v10  ;;  %v86_v27 = vld [vmem:[#allocation5 + $0x8] sm:$0xff]  ;;  %v186_v28 = vld [vmem:[#allocation7 + $0x18] sm:$0xff]  ;;  %v85_v29 = vld [vmem:[#allocation5] sm:$0xff] }
  0x3e   :  { %484 = vmatprep.subr.mxu0 %v750_v0  ;;  %519 = vmatprep.subr.mxu1 %v750_v0  ;;  %v84_v30 = vld [vmem:[#allocation2] sm:$0xff]  ;;  %v185_v31 = vld [vmem:[#allocation7 + $0x10] sm:$0xff]  ;;  %v184_v32 = vld [vmem:[#allocation7 + $0x8] sm:$0xff] }
  0x3f   :  { %485 = vmatpush3.msra.mxu0 %v96_v6  ;;  %520 = vmatpush3.msra.mxu1 %v194_v12  ;;  %v183_v33 = vld [vmem:[#allocation7] sm:$0xff]  ;;  %v422_v34 = vld [vmem:[%s900_s2] ss:$0 sm:$0xff]  ;;  %v298_v41 = vld [vmem:[#allocation8 + $0x70] sm:$0xff] }
  0x40   :  { %486 = vmatprep.subr.mxu0 %v750_v0  ;;  %521 = vmatprep.subr.mxu1 %v750_v0  ;;  %v299_v40 = vld [vmem:[#allocation8 + $0x78] sm:$0xff]  ;;  %v297_v42 = vld [vmem:[#allocation8 + $0x68] sm:$0xff]  ;;  %v296_v43 = vld [vmem:[#allocation8 + $0x60] sm:$0xff] }
  0x41   :  { %487 = vmatpush3.msra.mxu0 %v95_v9  ;;  %522 = vmatpush3.msra.mxu1 %v193_v14  ;;  %v295_v44 = vld [vmem:[#allocation8 + $0x58] sm:$0xff]  ;;  %v294_v45 = vld [vmem:[#allocation8 + $0x50] sm:$0xff]  ;;  %v293_v46 = vld [vmem:[#allocation8 + $0x48] sm:$0xff] }
  0x42   :  { %488 = vmatprep.subr.mxu0 %v750_v0  ;;  %523 = vmatprep.subr.mxu1 %v750_v0  ;;  %v292_v47 = vld [vmem:[#allocation8 + $0x40] sm:$0xff]  ;;  %v291_v48 = vld [vmem:[#allocation8 + $0x38] sm:$0xff]  ;;  %v290_v49 = vld [vmem:[#allocation8 + $0x30] sm:$0xff] }
  0x43   :  { %489 = vmatpush3.msra.mxu0 %v94_v11  ;;  %524 = vmatpush3.msra.mxu1 %v192_v16  ;;  %v289_v50 = vld [vmem:[#allocation8 + $0x28] sm:$0xff]  ;;  %v288_v51 = vld [vmem:[#allocation8 + $0x20] sm:$0xff]  ;;  %v287_v52 = vld [vmem:[#allocation8 + $0x18] sm:$0xff] }
  0x44   :  { %490 = vmatprep.subr.mxu0 %v750_v0  ;;  %525 = vmatprep.subr.mxu1 %v750_v0  ;;  %v286_v53 = vld [vmem:[#allocation8 + $0x10] sm:$0xff]  ;;  %v285_v54 = vld [vmem:[#allocation8 + $0x8] sm:$0xff]  ;;  %v284_v55 = vld [vmem:[#allocation8] sm:$0xff] }
  0x45   :  { %491 = vmatpush3.msra.mxu0 %v93_v13  ;;  %526 = vmatpush3.msra.mxu1 %v191_v18  ;;  %v423_v57 = vld [vmem:[%s902_s4] ss:$0 sm:$0xff] }
  0x46   :  { %492 = vmatprep.subr.mxu0 %v750_v0  ;;  %527 = vmatprep.subr.mxu1 %v750_v0 }
  0x47   :  { %493 = vmatpush3.msra.mxu0 %v92_v15  ;;  %528 = vmatpush3.msra.mxu1 %v190_v20 }
  0x48   :  { %494 = vmatprep.subr.mxu0 %v750_v0  ;;  %529 = vmatprep.subr.mxu1 %v750_v0 }
  0x49   :  { %495 = vmatpush3.msra.mxu0 %v91_v17  ;;  %530 = vmatpush3.msra.mxu1 %v189_v22 }
  0x4a   :  { %496 = vmatprep.subr.mxu0 %v750_v0  ;;  %531 = vmatprep.subr.mxu1 %v750_v0 }
  0x4b   :  { %497 = vmatpush3.msra.mxu0 %v90_v19  ;;  %532 = vmatpush3.msra.mxu1 %v188_v24 }
  0x4c   :  { %498 = vmatprep.subr.mxu0 %v750_v0  ;;  %533 = vmatprep.subr.mxu1 %v750_v0 }
  0x4d   :  { %499 = vmatpush3.msra.mxu0 %v89_v21  ;;  %534 = vmatpush3.msra.mxu1 %v187_v26 }
  0x4e   :  { %500 = vmatprep.subr.mxu0 %v750_v0  ;;  %535 = vmatprep.subr.mxu1 %v750_v0 }
  0x4f   :  { %501 = vmatpush3.msra.mxu0 %v88_v23  ;;  %536 = vmatpush3.msra.mxu1 %v186_v28 }
  0x50   :  { %502 = vmatprep.subr.mxu0 %v750_v0  ;;  %537 = vmatprep.subr.mxu1 %v750_v0 }
  0x51   :  { %503 = vmatpush3.msra.mxu0 %v87_v25  ;;  %538 = vmatpush3.msra.mxu1 %v185_v31 }
  0x52   :  { %504 = vmatprep.subr.mxu0 %v750_v0  ;;  %539 = vmatprep.subr.mxu1 %v750_v0 }
  0x53   :  { %505 = vmatpush3.msra.mxu0 %v86_v27  ;;  %540 = vmatpush3.msra.mxu1 %v184_v32 }
  0x54   :  { %506 = vmatprep.subr.mxu0 %v750_v0  ;;  %541 = vmatprep.subr.mxu1 %v750_v0 }
  0x55   :  { %507 = vmatpush3.msra.mxu0 %v85_v29  ;;  %542 = vmatpush3.msra.mxu1 %v183_v33 }
  0x56   :  { %509 = vmatmul.mubr.f32.vlgmr.msra.gmra.mxu0 %v84_v30  ;;  %546 = vmatprep.subr.mxu0 %v750_v0 }
  0x57   :  { %578 = vmatprep.mubr.msk.f32.mxu0 %vm751_vm0, %v750_v0  ;;  %547 = vmatpush3.msra.mxu0 %v299_v40 }
  0x58   :  { %548 = vmatprep.subr.mxu0 %v750_v0 }
  0x59   :  { %549 = vmatpush3.msra.mxu0 %v298_v41 }
  0x5a   :  { %550 = vmatprep.subr.mxu0 %v750_v0 }
  0x5b   :  { %551 = vmatpush3.msra.mxu0 %v297_v42 }
  0x5c   :  { %552 = vmatprep.subr.mxu0 %v750_v0 }
  0x5d   :  { %553 = vmatpush3.msra.mxu0 %v296_v43 }
  0x5e   :  { %554 = vmatprep.subr.mxu0 %v750_v0 }
  0x5f   :  { %555 = vmatpush3.msra.mxu0 %v295_v44 }
  0x60   :  { %556 = vmatprep.subr.mxu0 %v750_v0 }
  0x61   :  { %557 = vmatpush3.msra.mxu0 %v294_v45 }
  0x62   :  { %558 = vmatprep.subr.mxu0 %v750_v0 }
  0x63   :  { %559 = vmatpush3.msra.mxu0 %v293_v46 }
  0x64   :  { %560 = vmatprep.subr.mxu0 %v750_v0 }
  0x65   :  { %561 = vmatpush3.msra.mxu0 %v292_v47 }
  0x66   :  { %562 = vmatprep.subr.mxu0 %v750_v0 }
  0x67   :  { %563 = vmatpush3.msra.mxu0 %v291_v48 }
  0x68   :  { %564 = vmatprep.subr.mxu0 %v750_v0 }
  0x69   :  { %565 = vmatpush3.msra.mxu0 %v290_v49 }
  0x6a   :  { %566 = vmatprep.subr.mxu0 %v750_v0 }
  0x6b   :  { %567 = vmatpush3.msra.mxu0 %v289_v50 }
  0x6c   :  { %568 = vmatprep.subr.mxu0 %v750_v0 }
  0x6d   :  { %569 = vmatpush3.msra.mxu0 %v288_v51 }
  0x6e   :  { %570 = vmatprep.subr.mxu0 %v750_v0 }
  0x6f   :  { %571 = vmatpush3.msra.mxu0 %v287_v52 }
  0x70   :  { %572 = vmatprep.subr.mxu0 %v750_v0 }
  0x71   :  { %573 = vmatpush3.msra.mxu0 %v286_v53 }
  0x72   :  { %574 = vmatprep.subr.mxu0 %v750_v0 }
  0x73   :  { %575 = vmatpush3.msra.mxu0 %v285_v54 }
  0x74   :  { %576 = vmatprep.subr.mxu0 %v750_v0 }
  0x75   :  { %577 = vmatpush3.msra.mxu0 %v284_v55 }
 0x116   :  { %v174_v35 = vpop.f32.mrf.mxu0 }
 0x117   :  { %v175_v36 = vadd.f32 %v422_v34, %v174_v35 }
 0x118   :  { %v510_v37 = vpop.f32.mrf.mxu0 }
 0x119   :  { %v178_v38 = vmax.f32 %v175_v36, 0.0 }
 0x11b   :  { %179 = vst [vmem:[#allocation13] sm:$0xff] %v178_v38  ;;  %544 = vmatmul.mubr.f32.vlgmr.msra.gmra.mxu1 %v178_v38  ;;  %v180_v39 = vmul.f32 %v178_v38, %v178_v38 }
 0x11d   :  { %181 = vadd.xlane.f32.xlu0 %v180_v39 }
 0x1a6   :  { %v182_v56 = vpop.xlane.xlu0 %181 }
 0x1a7   :  { %v276_v59 = vadd.f32 %v423_v57, %v182_v56 }
 0x1db   :  { %v265_v58 = vpop.f32.mrf.mxu1 }
 0x1dc   :  { %v277_v60 = vmul.f32 2.0, %v265_v58 }
 0x1dd   :  { %v545_v61 = vpop.f32.mrf.mxu1 }
 0x1de   :  { %v278_v62 = vsub.f32 %v276_v59, %v277_v60 }
 0x1e0   :  { %v279_v63 = vmax.f32 %v278_v62, 0.0 }
 0x1e2   :  { %v280_v1 = vsub.f32 0.0, %v279_v63 }
 0x1e4   :  { %v281_v2 = vmul.f32 1.442695, %v280_v1 }
 0x1e6   :  { %592 = vpow2.f32 %v281_v2 }
 0x1f3   :  { %v593_v3 = vpop.eup %592 }
 0x1f4   :  { %283 = vst [vmem:[#allocation11] sm:$0xff] %v593_v3  ;;  %579 = vmatmul.mubr.f32.vlgmr.msra.gmra.mxu0 %v593_v3 }
 0x1f5   :  { %685 = shalt.err (!%p682_p10)
}
 0x1f6   :  { %397 = dma.vmem_to_hbm [thread:$0]  %s395_s10, 128, %s906_s8, [#allocation12]  }
 0x1f7   :  { %s753_s13 = smov [#allocation13]  }
 0x1f8   :  { %s404_s14 = sshll.u32 %s753_s13, 4  ;;  %s405_s14 = int_to_ptr.vmem [resolvable:$true] %s404_s14 }
 0x1f9   :  { %s694_s15 = scalar_lea.vmem %s405_s14, 128  ;;  %p699_p12 = scmp.lt.s32.totalorder %s405_s14, %s405_s14 }
 0x1fa   :  { %p695_p11 = scmp.ne.s32.totalorder %s405_s14, %s694_s15  ;;  %p700_p13 = scmp.lt.s32.totalorder %s694_s15, %s694_s15 }
 0x1fc   :  { %p701_p0 = por %p700_p13, %p699_p12 }
 0x1fe   :  { %p702_p1 = pnand %p701_p0, %p695_p11 }
 0x200   :  { %705 = shalt.err (!%p702_p1)
}
 0x201   :  { %407 = dma.vmem_to_hbm [thread:$0]  %s405_s14, 128, %s907_s9, [#allocation12]   ;;  %v424_v0 = vld [vmem:[%s904_s6] ss:$0 sm:$0xff] }
 0x202   :  { %s754_s20 = smov [#allocation10]  }
 0x203   :  { %s384_s8 = sshll.u32 %s754_s20, 4  ;;  %s385_s8 = int_to_ptr.vmem [resolvable:$true] %s384_s8 }
 0x204   :  { %s714_s21 = scalar_lea.vmem %s385_s8, 128  ;;  %p719_p3 = scmp.lt.s32.totalorder %s385_s8, %s385_s8 }
 0x205   :  { %p715_p2 = scmp.ne.s32.totalorder %s385_s8, %s714_s21  ;;  %p720_p4 = scmp.lt.s32.totalorder %s714_s21, %s714_s21 }
 0x207   :  { %p721_p5 = por %p720_p4, %p719_p3 }
 0x209   :  { %p722_p6 = pnand %p721_p5, %p715_p2 }
 0x2b4   :  { %v373_v4 = vpop.f32.mrf.mxu0 }
 0x2b5   :  { %v374_v5 = vadd.f32 %v424_v0, %v373_v4 }
 0x2b6   :  { %v580_v6 = vpop.f32.mrf.mxu0 }
 0x2b7   :  { %377 = vst [vmem:[#allocation10] sm:$0xff] %v374_v5 }
 0x2b8   :  { %725 = shalt.err (!%p722_p6)
}
 0x2b9   :  { %387 = dma.vmem_to_hbm [thread:$0]  %s385_s8, 128, %s905_s7, [#allocation4]  }
 0x2ba   :  { %740 = dma.done.wait [#allocation4], 128  }
 0x2bb   :  { %741 = vsyncadd [#allocation4], 4294967168 }
 0x2bc   :  { %742 = dma.done.wait [#allocation12], 256  }
 0x2bd   :  { %743 = vsyncadd [#allocation12], 4294967040 }
 0x2be   :  { %417 = vsyncpa [#allocation3], 1 }
 0x2bf   :  { %418 = vsyncpa [#allocation6], 1 }
 0x2c0   :  { %419 = vsyncpa [#allocation9], 1 }
 0x2c1   :  { %420 = vsyncpa [#allocation4], 1 }
 0x2c2   :  { %421 = vsyncpa [#allocation12], 1 }

</bundles_post_ra>
